<compile_context>
chip_gen: v7x
topology: tpu7x:2x2x1
jax: 0.10.0
libtpu: 0.0.40
codegen_flags: <defaults>
</compile_context>

<pallas_src>
import jax
import jax.numpy as jnp
import numpy as np
from jax import lax
from jax.experimental import pallas as pl
from jax.experimental.pallas import tpu as pltpu


# ---------------------------------------------------------------------------
# Kernel 1: CLS-token raw attention scores (scaled dots; softmax dropped —
#           ranking-equivalent and the probabilities are never used downstream)
# ---------------------------------------------------------------------------
def _cls_scores_kernel(x_ref, out_ref):
    xb = x_ref[...]                                  # (Bt, T, D)
    q = xb[:, 0:1, :]                                # (Bt, 1, D)  CLS token
    scale = xb.shape[-1] ** -0.5
    # VPU multiply + lane reduction (avoids a tiny 1xD MXU matmul).
    out_ref[...] = jnp.sum(xb * q, axis=-1) * scale  # (Bt, T)


def cls_scores(x, bt=32):
    # bt=32 ≈ 19 MiB double-buffered for ViT-size (fits v7x's 32 MiB scoped
    # default); go 64 on v5e/v6e with vmem_limit_bytes raised if desired.
    B, T, D = x.shape
    bt = min(bt, B)
    pad = (-B) % bt
    if pad:
        x = jnp.pad(x, ((0, pad), (0, 0), (0, 0)))
    Bp = B + pad
    ce = pl.CostEstimate(flops=2 * Bp * T * D,
                         transcendentals=0,
                         bytes_accessed=4 * Bp * T * (D + 1))
    out = pl.pallas_call(
        _cls_scores_kernel,
        out_shape=jax.ShapeDtypeStruct((Bp, T), jnp.float32),
        grid=(Bp // bt,),
        in_specs=[pl.BlockSpec((bt, T, D), lambda b: (b, 0, 0))],
        out_specs=pl.BlockSpec((bt, T), lambda b: (b, 0)),
        compiler_params=pltpu.CompilerParams(dimension_semantics=("parallel",)),
        cost_estimate=ce,
    )(x)
    return out[:B]                                   # (B, T)


# ---------------------------------------------------------------------------
# Kernel 2: token purification gather, Bb batch elements per grid step.
# Tokens / pos-embeddings for the Bb batches sit resident in VMEM and the
# len_keep rows are selected with an exact pre-transposed one-hot batched
# matmul on the MXU (sel's last dim contracts against x's row dim, so no XLU
# transpose).  The CLS offset (+1) is folded into the one-hot so we never
# materialize the x_lead[:, 1:, :] slice in HBM.
# ---------------------------------------------------------------------------
def _gather_kernel(ids_ref, x_ref, pos_ref, ox_ref, op_ref):
    ids = ids_ref[...]                               # (Bb, K) int32, in [0, L)
    Bb, K = ids.shape
    T = x_ref.shape[1]                               # = L + 1 (CLS at row 0)
    L = pos_ref.shape[1]

    # Pre-transposed one-hot: sel_x[b, k, t] = (t == ids[b, k] + 1)
    t_iota = lax.broadcasted_iota(jnp.int32, (Bb, K, T), 2)
    sel_x = (t_iota == (ids + 1)[:, :, None]).astype(jnp.float32)   # (Bb,K,T)
    l_iota = lax.broadcasted_iota(jnp.int32, (Bb, K, L), 2)
    sel_p = (l_iota == ids[:, :, None]).astype(jnp.float32)         # (Bb,K,L)

    # Exact gather (1.0 * row + zeros); contraction dim is sel's LAST dim.
    ox_ref[...] = jnp.einsum('bkt,btd->bkd', sel_x, x_ref[...],
                             preferred_element_type=jnp.float32
                             ).astype(ox_ref.dtype)
    op_ref[...] = jnp.einsum('bkl,blp->bkp', sel_p, pos_ref[...],
                             preferred_element_type=jnp.float32
                             ).astype(op_ref.dtype)


def gather_tokens(x_lead, pos, ids_keep, bb=8):
    # bb=8 keeps the double-buffered working set well inside v7x's 32 MiB
    # scoped VMEM for ViT-sized shapes; raise to 16-32 (with vmem_limit_bytes)
    # on v5e/v6e if profiling shows headroom.
    B, T, D = x_lead.shape
    L, P = pos.shape[1], pos.shape[2]
    K = ids_keep.shape[-1]
    bb = min(bb, B)
    pad = (-B) % bb
    if pad:
        x_lead = jnp.pad(x_lead, ((0, pad), (0, 0), (0, 0)))
        pos = jnp.pad(pos, ((0, pad), (0, 0), (0, 0)))
        ids_keep = jnp.pad(ids_keep, ((0, pad), (0, 0)))  # pads index 0 (valid)
    Bp = B + pad
    ce = pl.CostEstimate(
        flops=2 * Bp * K * (T * D + L * P),
        transcendentals=0,
        bytes_accessed=4 * Bp * (T * D + L * P + K * D + K * P + K))
    out_x, out_p = pl.pallas_call(
        _gather_kernel,
        out_shape=(jax.ShapeDtypeStruct((Bp, K, D), x_lead.dtype),
                   jax.ShapeDtypeStruct((Bp, K, P), pos.dtype)),
        grid=(Bp // bb,),
        in_specs=[pl.BlockSpec((bb, K), lambda b: (b, 0)),
                  pl.BlockSpec((bb, T, D), lambda b: (b, 0, 0)),
                  pl.BlockSpec((bb, L, P), lambda b: (b, 0, 0))],
        out_specs=[pl.BlockSpec((bb, K, D), lambda b: (b, 0, 0)),
                   pl.BlockSpec((bb, K, P), lambda b: (b, 0, 0))],
        compiler_params=pltpu.CompilerParams(dimension_semantics=("parallel",)),
        cost_estimate=ce,
    )(ids_keep.astype(jnp.int32), x_lead, pos)
    return out_x[:B], out_p[:B]


# ---------------------------------------------------------------------------
# Token_Purification.forward  (pure_ways='atten')
# ---------------------------------------------------------------------------
def token_purification(x_lead, x_pos_masked, purification_ratio=0.5):
    # TODO(synk): 'random' / 'combine' purification paths (torch.rand + shuffle)
    # are not implemented; only the deterministic default 'atten' path is.
    B, T, D = x_lead.shape
    L = T - 1
    len_keep = int(L * purification_ratio)
    if len_keep < 1:
        raise ValueError("purification_ratio * L must keep at least 1 token")

    scores = cls_scores(x_lead)                       # (B, T) scaled CLS dots
    # softmax dropped: monotone transform, ranking identical, probs unused.
    _, ids_keep = lax.top_k(scores[:, 1:], len_keep)  # (B, len_keep) int32

    x_sel, pos_sel = gather_tokens(x_lead, x_pos_masked, ids_keep)
    return x_sel, pos_sel                             # (B, K, D), (B, K, P)


# ---------------------------------------------------------------------------
# Pure-JAX reference (mirrors the PyTorch forward, pure_ways='atten')
# ---------------------------------------------------------------------------
def reference(x_lead, x_pos, ratio=0.5):
    B, T, D = x_lead.shape
    scale = D ** -0.5
    dots = jnp.einsum('bid,bjd->bij', x_lead, x_lead) * scale
    attn = jax.nn.softmax(dots, axis=-1)
    a = attn[:, 0, 1:]
    toks = x_lead[:, 1:, :]
    L = T - 1
    len_keep = int(L * ratio)
    ids = jnp.argsort(-a, axis=1)[:, :len_keep]
    xs = jnp.take_along_axis(toks, ids[:, :, None], axis=1)
    ps = jnp.take_along_axis(x_pos, ids[:, :, None], axis=1)
    return xs, ps


if __name__ == "__main__":
    B, L, D, P = 2, 16, 32, 32          # T = L + 1 = 17 tokens (CLS + L)
    key = jax.random.PRNGKey(0)
    k1, k2 = jax.random.split(key)
    x_lead = jax.random.normal(k1, (B, L + 1, D), dtype=jnp.float32)
    x_pos_masked = jax.random.normal(k2, (B, L, P), dtype=jnp.float32)

    x_sel, pos_sel = token_purification(x_lead, x_pos_masked, 0.5)
    jax.block_until_ready((x_sel, pos_sel))

    x_ref, pos_ref = reference(x_lead, x_pos_masked, 0.5)
    assert x_sel.shape == (B, L // 2, D) and pos_sel.shape == (B, L // 2, P)
    np.testing.assert_allclose(np.asarray(x_sel), np.asarray(x_ref),
                               rtol=1e-5, atol=1e-5)
    np.testing.assert_allclose(np.asarray(pos_sel), np.asarray(pos_ref),
                               rtol=1e-5, atol=1e-5)
    print("KERNEL_OK")
</pallas_src>

<mosaic_0001>
module attributes {stable_mosaic.version = 11 : i64} {
  func.func @_cls_scores_kernel(%arg0: i32, %arg1: memref<2x17x32xf32, #tpu.memory_space<vmem>>, %arg2: memref<2x17xf32, #tpu.memory_space<vmem>>) attributes {dimension_semantics = [#tpu.dimension_semantics<parallel>], iteration_bounds = array<i64: 1>, scalar_prefetch = 0 : i64, scratch_operands = 0 : i64, tpu.core_type = #tpu.core_type<tc>, window_params = [{transform_indices = @transform_0, window_bounds = array<i64: 2, 17, 32>}, {transform_indices = @transform_1, window_bounds = array<i64: 2, 17>}]} {
    %c0 = arith.constant 0 : index
    %c0_0 = arith.constant 0 : index
    %c0_1 = arith.constant 0 : index
    %0 = vector.load %arg1[%c0, %c0_0, %c0_1] : memref<2x17x32xf32, #tpu.memory_space<vmem>>, vector<2x17x32xf32>
    %1 = vector.extract_strided_slice %0 {offsets = [0, 0, 0], sizes = [2, 1, 32], strides = [1, 1, 1]} : vector<2x17x32xf32> to vector<2x1x32xf32>
    %2 = vector.broadcast %1 : vector<2x1x32xf32> to vector<2x17x32xf32>
    %3 = arith.mulf %0, %2 : vector<2x17x32xf32>
    %cst = arith.constant dense<0.000000e+00> : vector<2x17xf32>
    %4 = vector.multi_reduction <add>, %3, %cst [2] : vector<2x17x32xf32> to vector<2x17xf32>
    %cst_2 = arith.constant 0.176776692 : f32
    %5 = vector.broadcast %cst_2 : f32 to vector<2x17xf32>
    %6 = arith.mulf %4, %5 : vector<2x17xf32>
    %c0_3 = arith.constant 0 : index
    %c0_4 = arith.constant 0 : index
    %7 = vector.load %arg2[%c0_3, %c0_4] : memref<2x17xf32, #tpu.memory_space<vmem>>, vector<2x17xf32>
    tpu.vector_store %arg2[%c0_3, %c0_4], %6 {strides = array<i32>} : memref<2x17xf32, #tpu.memory_space<vmem>>, vector<2x17xf32>,
    return
  }
  func.func @transform_0(%arg0: i32) -> (i32, i32, i32) {
    %c0_i32 = arith.constant 0 : i32
    %c0_i32_0 = arith.constant 0 : i32
    %c0_i32_1 = arith.constant 0 : i32
    return %arg0, %c0_i32, %c0_i32_0 : i32, i32, i32
  }
  func.func @transform_1(%arg0: i32) -> (i32, i32) {
    %c0_i32 = arith.constant 0 : i32
    %c0_i32_0 = arith.constant 0 : i32
    return %arg0, %c0_i32 : i32, i32
  }
}

</mosaic_0001>

<bundles_post_ra>
// kernel: tpu_custom_call.1
= control target key start
LH: loop header
LB: loop body
LE: loop exit
PB: predicated region body
PF: predicated region fallthrough
CT: control target
= control target key end

     0   :  { %v15_v0 = vlaneseq  ;;  %s180_s0 = inlined_call_operand.vmem [shape: f32[2,17,32], index: 0, kind: input, shape index: {}]   ;;  %s181_s1 = inlined_call_operand.hbm [shape: f32[2,17], index: 1, kind: output, shape index: {}]  }
   0x2   :  { %v16_v1 = vshrl.u32 %v15_v0, 7  ;;  %v62_v2 = vand.u32 127, %v15_v0 }
   0x3   :  { %6 = vsyncpa [#allocation3], 0  ;;  %v12_v3 = vld [vmem:[%s180_s0 + $0x18] sm:$0xff]  ;;  %v9_v4 = vld [vmem:[%s180_s0] sm:$0xff]  ;;  %vm29_vm0 = vcmask 261120   ;;  %vm36_vm1 = vcmask 253952  }
   0x4   :  { %v17_v5 = vsub.s32 0, %v16_v1  ;;  %v65_v6 = vsub.s32 %v62_v2, %v16_v1  ;;  %v13_v7 = vld [vmem:[%s180_s0 + $0x20] sm:$0xff]  ;;  %v10_v8 = vld [vmem:[%s180_s0 + $0x8] sm:$0xff]  ;;  %v11_v16 = vld [vmem:[%s180_s0 + $0x10] sm:$0x1]  ;;  %v67_v25 = vadd.s32 4294967288, %v62_v2 }
   0x5   :  { %v14_v15 = vld [vmem:[%s180_s0 + $0x28] sm:$0x1]  ;;  %v74_v27 = vadd.s32 4294967280, %v62_v2  ;;  %vm72_vm2 = vcmask 130112   ;;  %vm79_vm3 = vcmask 195712   ;;  %s139_s0 = smov [#allocation2]  }
   0x6   :  { %v22_v9 = vrot.slane %v12_v3, %v17_v5  ;;  %v18_v10 = vrot.slane %v9_v4, %v17_v5  ;;  %v70_v26 = vsub.s32 %v67_v25, %v16_v1  ;;  %s106_s18 = sshll.u32 %s139_s0, 4  ;;  %vm95_vm4 = vcmask 1041409   ;;  %s107_s18 = int_to_ptr.vmem [resolvable:$true] %s106_s18 }
   0x7   :  { %v77_v28 = vsub.s32 %v74_v27, %v16_v1  ;;  %vm98_vm5 = vcmask 132096   ;;  %s115_s19 = scalar_lea.vmem %s107_s18, 32  ;;  %p120_p1 = scmp.lt.s32.totalorder %s107_s18, %s107_s18 }
   0x8   :  { %v26_v11 = vmul.f32 %v22_v9, %v12_v3  ;;  %v23_v12 = vmul.f32 %v18_v10, %v9_v4  ;;  %v27_v13 = vmul.f32 %v22_v9, %v13_v7  ;;  %v24_v14 = vmul.f32 %v18_v10, %v10_v8  ;;  %p116_p0 = scmp.ne.s32.totalorder %s107_s18, %s115_s19  ;;  %p121_p2 = scmp.lt.s32.totalorder %s115_s19, %s115_s19 }
   0x9   :  { %v28_v21 = vmul.f32 %v22_v9, %v14_v15  ;;  %v25_v22 = vmul.f32 %v18_v10, %v11_v16 }
   0xa   :  { %v40_v17 = vsel %vm29_vm0, %v26_v11, 0.0  ;;  %v30_v18 = vsel %vm29_vm0, %v23_v12, 0.0  ;;  %v43_v19 = vsel %vm29_vm0, %v27_v13, 0.0  ;;  %v33_v20 = vsel %vm29_vm0, %v24_v14, 0.0  ;;  %p122_p3 = por %p121_p2, %p120_p1 }
   0xb   :  { %41 = vadd.xlane.f32.xlu1 %v40_v17  ;;  %31 = vadd.xlane.f32.xlu0 %v30_v18  ;;  %v46_v23 = vsel %vm36_vm1, %v28_v21, 0.0  ;;  %v37_v24 = vsel %vm36_vm1, %v25_v22, 0.0 }
   0xc   :  { %p123_p4 = pnand %p122_p3, %p116_p0 }
   0xf   :  { %44 = vadd.xlane.f32.xlu1 %v43_v19  ;;  %34 = vadd.xlane.f32.xlu0 %v33_v20 }
  0x13   :  { %47 = vadd.xlane.f32.xlu1 %v46_v23  ;;  %38 = vadd.xlane.f32.xlu0 %v37_v24 }
  0x98   :  { %v42_v29 = vpop.xlane.xlu1 %41  ;;  %v32_v30 = vpop.xlane.xlu0 %31 }
  0x99   :  { %v52_v31 = vmul.f32 0.17677669, %v42_v29  ;;  %v49_v32 = vmul.f32 0.17677669, %v32_v30 }
  0x9b   :  { %v84_v37 = vrot.slane %v52_v31, %v65_v6  ;;  %v66_v38 = vrot.slane %v49_v32, %v65_v6 }
  0x9c   :  { %v45_v33 = vpop.xlane.xlu1 %44  ;;  %v35_v34 = vpop.xlane.xlu0 %34 }
  0x9d   :  { %v53_v35 = vmul.f32 0.17677669, %v45_v33  ;;  %v50_v36 = vmul.f32 0.17677669, %v35_v34 }
  0x9f   :  { %v88_v39 = vrot.slane %v53_v35, %v70_v26  ;;  %v71_v40 = vrot.slane %v50_v36, %v70_v26 }
  0xa0   :  { %v48_v41 = vpop.xlane.xlu1 %47  ;;  %v39_v42 = vpop.xlane.xlu0 %38 }
  0xa1   :  { %v89_v43 = vsel %vm72_vm2, %v88_v39, %v84_v37  ;;  %v73_v44 = vsel %vm72_vm2, %v71_v40, %v66_v38  ;;  %v54_v45 = vmul.f32 0.17677669, %v48_v41  ;;  %v51_v46 = vmul.f32 0.17677669, %v39_v42 }
  0xa3   :  { %v93_v47 = vrot.slane %v54_v45, %v77_v28  ;;  %v78_v48 = vrot.slane %v51_v46, %v77_v28 }
  0xa5   :  { %v80_v49 = vsel %vm79_vm3, %v78_v48, %v73_v44  ;;  %v94_v50 = vsel %vm79_vm3, %v93_v47, %v89_v43 }
  0xa6   :  { %v96_v51 = vsel %vm95_vm4, %v94_v50, %v80_v49 }
  0xa7   :  { %99 = vst.msk [vmem:[#allocation2] sm:$0x3] %vm98_vm5, %v96_v51 }
  0xa8   :  { %126 = shalt.err (!%p123_p4)
}
  0xa9   :  { %s127_s22 = scalar_lea.hbm %s181_s1, 32 }
  0xaa   :  { %p128_p5 = scmp.ne.s32.totalorder %s181_s1, %s127_s22  ;;  %p131_p6 = scmp.lt.u32.totalorder %s127_s22, %s181_s1 }
  0xac   :  { %p133_p7 = pnand %p131_p6, %p128_p5 }
  0xae   :  { %136 = shalt.err (!%p133_p7)
}
  0xaf   :  { %109 = dma.vmem_to_hbm [thread:$0]  %s107_s18, 32, %s181_s1, [#allocation3]  }
  0xb0   :  { %137 = dma.done.wait [#allocation3], 32  }
  0xb1   :  { %138 = vsyncadd [#allocation3], 4294967264 }
  0xb2   :  { %113 = vsyncpa [#allocation3], 1 }

</bundles_post_ra>
